<compile_context>
chip_gen: v6e
topology: v6e:2x2x1
jax: 0.10.0
libtpu: 0.0.40
codegen_flags: <defaults>
</compile_context>

<pallas_src>
import functools

import jax
import jax.numpy as jnp
from jax.experimental import pallas as pl
from jax.experimental.pallas import tpu as pltpu


def _round_up(x, m):
    return ((x + m - 1) // m) * m


def _vmem_capacity_bytes(default=64 * 1024 * 1024):
    """Best-effort VMEM capacity query (falls back to the v7x 64 MiB floor)."""
    try:
        info = pltpu.get_tpu_info()
        for name in ("vmem_capacity_bytes", "vmem_bytes", "vmem_size_bytes"):
            val = getattr(info, name, None)
            if val:
                return int(val)
    except Exception:
        pass
    return default


def _vmem_estimate_bytes(TN, Wp, K, I, O, w_dim, add_noise, out_itemsize):
    """Rough steady-state VMEM footprint for a given HW-tile width TN."""
    KK = K * K
    TCHUNK = TN + (K - 1) * Wp + (K - 1)
    b = 0
    b += 2 * I * TCHUNK * 2                      # x tile (bf16, double-buffered)
    b += 2 * O * TN * out_itemsize               # output tile (double-buffered)
    if add_noise:
        b += 2 * TN * 2                          # noise tile (bf16, double-buffered)
    b += 2 * KK * O * I * 2                      # conv weight (bf16, pipeline buffers)
    b += 2 * (w_dim * I + I + O + w_dim) * 4     # A weight/bias, bias, latent
    b += O * KK * I * 2                          # wmod scratch (bf16)
    b += KK * I * TN * 2                         # fused im2col rhs scratch (bf16)
    # transient values: f32 conv accumulator, f32 modulated weight, one x slice
    b += O * TN * 4 + KK * O * I * 4 + I * TN * 2
    return b


def _style_block_kernel(w_ref, aW_ref, aB_ref, convW_ref, x_ref, bias_ref,
                        *rest, demod, add_noise, eps, neg_slope, K, I, Wp, TN):
    """One (batch element, HW tile) step of the StyleBlock forward.

    w_ref     : (1, w_dim)           latent for this batch element
    aW_ref    : (w_dim, I)           EqualLinear weight (eq-lr scaled, transposed)
    aB_ref    : (1, I)               EqualLinear bias
    convW_ref : (K*K, O, I)  bf16    shared conv weight (eq-lr scaled), I on lanes
    x_ref     : (I, TN + HALO) bf16  input tile on the flattened padded grid
    bias_ref  : (O, 1)               StyleBlock output bias
    [noise_ref: (1, TN)  bf16        noise tile               (only if add_noise)]
    [scale_ref: (1,)     SMEM        AdditiveNoiseBlock scale (only if add_noise)]
    out_ref   : (O, TN)              output tile (TN % 128 == 0 -> unmasked stores)
    wmod_ref  : (O, K*K*I)  bf16     per-sample modulated weight, fused layout (scratch)
    rhs_ref   : (K*K*I, TN) bf16     fused im2col rhs for this tile       (scratch)
    """
    if add_noise:
        noise_ref, scale_ref, out_ref, wmod_ref, rhs_ref = rest
    else:
        out_ref, wmod_ref, rhs_ref = rest
        noise_ref = scale_ref = None

    KK = K * K
    nt = pl.program_id(1)

    # ---- per-sample style path: run once (first HW tile), keep wmod resident ----
    @pl.when(nt == 0)
    def _():
        scores = jnp.dot(w_ref[...], aW_ref[...],
                         preferred_element_type=jnp.float32) + aB_ref[...]   # (1, I)
        wmod = convW_ref[...].astype(jnp.float32) * scores                   # (KK, O, I)
        if demod:
            ss = jnp.sum(wmod * wmod, axis=(0, 2), keepdims=True)            # (1, O, 1)
            wmod = wmod * jax.lax.rsqrt(ss + eps)
        wmod_bf = wmod.astype(wmod_ref.dtype)
        # Store in the fused (O, KK*I) layout so the conv below is ONE MXU matmul
        # with contraction depth KK*I (no per-tap partial-sum adds).
        for kidx in range(KK):
            wmod_ref[:, kidx * I:(kidx + 1) * I] = wmod_bf[kidx]

    # ---- assemble the fused im2col rhs for this tile: K*K shifted slices ----
    # TODO(synk): lane-align these copies for large W (pad Wp to 128 + pltpu.roll).
    for ky in range(K):
        for kx in range(K):
            kidx = ky * K + kx
            off = ky * Wp + kx                                    # static shift
            rhs_ref[kidx * I:(kidx + 1) * I, :] = x_ref[:, off:off + TN]

    # ---- single fused MXU matmul: (O, KK*I) x (KK*I, TN) -> (O, TN) f32 ----
    acc = jnp.dot(wmod_ref[...], rhs_ref[...], preferred_element_type=jnp.float32)

    if add_noise:
        acc = acc + scale_ref[0] * noise_ref[...].astype(jnp.float32)  # (1,TN) bcast
    acc = acc + bias_ref[...]                                          # (O,1) bcast
    out_ref[...] = jnp.where(acc > 0, acc, neg_slope * acc).astype(out_ref.dtype)


def style_block_forward(x, w_lat, stochastic_noise, params, *, kernel_size,
                        padding, demod=True, add_noise=True, eps=1e-8,
                        neg_slope=0.2, tile_n=1024, out_dtype=jnp.float32):
    """x: [B, I, H, W] NCHW, w_lat: [B, w_dim], stochastic_noise: [B, 1, FH, FW]."""
    if add_noise and stochastic_noise is None:
        raise RuntimeError("Cannot input None as stochastic noise when "
                           "'add_noise' is set to True for the style block.")
    B, I, H, W = x.shape
    K = kernel_size
    O = params["conv_w"].shape[0]
    w_dim = w_lat.shape[1]
    Hp, Wp = H + 2 * padding, W + 2 * padding
    Ho, Wo = Hp - K + 1, Wp - K + 1
    KK = K * K
    out_itemsize = jnp.dtype(out_dtype).itemsize

    # Output is computed on the flattened *padded* grid (Ho rows x Wp columns);
    # the (Wp - Wo) trailing columns per row are garbage and sliced away below.
    N_valid = Ho * Wp

    # HW tile width: lane-dense (multiple of 128), scaled with the row width so the
    # duplicated halo (~(K-1)*Wp) stays a small fraction of each tile, shrunk until
    # the steady-state VMEM footprint fits in ~half of physical VMEM.
    cap = _vmem_capacity_bytes()
    budget = cap // 2
    TN = _round_up(max(int(tile_n), 4 * Wp), 128)
    TN = max(128, min(TN, _round_up(N_valid, 128)))
    while TN > 128 and _vmem_estimate_bytes(TN, Wp, K, I, O, w_dim, add_noise,
                                            out_itemsize) > budget:
        TN -= 128
    NT = pl.cdiv(N_valid, TN)
    N_total = NT * TN
    HALO = (K - 1) * Wp + (K - 1)          # largest static shift used in-kernel
    TCHUNK = TN + HALO

    # ---- parameter prep (pure layout glue + equalized-lr scaling) ----
    a_scale = 1.0 / jnp.sqrt(jnp.float32(w_dim))                  # EqualLinear eq-lr
    aW = (params["a_w"] * a_scale).T.astype(jnp.float32)          # (w_dim, I)
    aB = params["a_b"].reshape(1, I).astype(jnp.float32)          # (1, I)
    conv_scale = 1.0 / jnp.sqrt(jnp.float32(I * K * K))           # conv eq-lr
    convW = (params["conv_w"] * conv_scale).transpose(2, 3, 0, 1)
    convW = convW.reshape(KK, O, I).astype(jnp.bfloat16)          # bf16: feeds bf16 wmod
    bias = params["bias"].reshape(O, 1).astype(jnp.float32)
    w_lat3 = w_lat.reshape(B, 1, w_dim).astype(jnp.float32)

    # ---- input prep: pad, flatten padded grid, halo-duplicated tiles, bf16 ----
    xp = jnp.pad(x, ((0, 0), (0, 0), (padding, padding), (padding, padding)))
    x_flat = xp.reshape(B, I, Hp * Wp)
    x_flat = jnp.pad(x_flat, ((0, 0), (0, 0), (0, N_total + HALO - Hp * Wp)))
    xt = jnp.stack([x_flat[:, :, t * TN: t * TN + TCHUNK] for t in range(NT)],
                   axis=1).astype(jnp.bfloat16)                   # (B, NT, I, TCHUNK)

    inputs = [w_lat3, aW, aB, convW, xt, bias]
    in_specs = [
        pl.BlockSpec((None, 1, w_dim), lambda b, t: (b, 0, 0)),   # latent (per sample)
        pl.BlockSpec((w_dim, I), lambda b, t: (0, 0)),            # A weight (shared)
        pl.BlockSpec((1, I), lambda b, t: (0, 0)),                # A bias   (shared)
        pl.BlockSpec((KK, O, I), lambda b, t: (0, 0, 0)),         # conv weight (shared)
        pl.BlockSpec((None, None, I, TCHUNK), lambda b, t: (b, t, 0, 0)),  # x tile+halo
        pl.BlockSpec((O, 1), lambda b, t: (0, 0)),                # output bias (shared)
    ]
    hbm_bytes = (xt.size * 2 + aW.size * 4 + aB.size * 4 + convW.size * 2
                 + bias.size * 4 + w_lat3.size * 4 + B * O * N_total * out_itemsize)
    if add_noise:
        noise = stochastic_noise[:, 0, :Ho, :Wo].astype(jnp.float32)
        noise = jnp.pad(noise, ((0, 0), (0, 0), (0, Wp - Wo))).reshape(B, N_valid)
        noise = jnp.pad(noise, ((0, 0), (0, N_total - N_valid)))
        noise = noise.reshape(B, 1, N_total).astype(jnp.bfloat16)
        scale_noise = params["scale_noise"].reshape(1).astype(jnp.float32)
        inputs += [noise, scale_noise]
        in_specs += [
            pl.BlockSpec((None, 1, TN), lambda b, t: (b, 0, t)),  # noise tile
            pl.BlockSpec(memory_space=pltpu.MemorySpace.SMEM),    # scale_noise scalar
        ]
        hbm_bytes += noise.size * 2 + 4

    kernel = functools.partial(_style_block_kernel, demod=demod,
                               add_noise=add_noise, eps=float(eps),
                               neg_slope=float(neg_slope), K=K, I=I, Wp=Wp, TN=TN)

    est = _vmem_estimate_bytes(TN, Wp, K, I, O, w_dim, add_noise, out_itemsize)
    vmem_limit = int(min(cap, max(32 * 1024 * 1024, 2 * est)))
    cost = pl.CostEstimate(
        flops=int(2 * B * NT * O * KK * I * TN + 2 * B * w_dim * I),
        transcendentals=int(B * O if demod else 0),
        bytes_accessed=int(hbm_bytes),
    )

    out = pl.pallas_call(
        kernel,
        out_shape=jax.ShapeDtypeStruct((B, O, N_total), out_dtype),
        grid_spec=pltpu.PrefetchScalarGridSpec(
            num_scalar_prefetch=0,
            grid=(B, NT),
            in_specs=in_specs,
            out_specs=pl.BlockSpec((None, O, TN), lambda b, t: (b, 0, t)),
            scratch_shapes=[pltpu.VMEM((O, KK * I), jnp.bfloat16),   # resident wmod
                            pltpu.VMEM((KK * I, TN), jnp.bfloat16)],  # fused im2col rhs
        ),
        compiler_params=pltpu.CompilerParams(
            # Batch axis parallel (megacore); HW-tile axis must stay sequential so
            # the wmod scratch written at nt == 0 is valid for later tiles.
            dimension_semantics=("parallel", "arbitrary"),
            vmem_limit_bytes=vmem_limit,
        ),
        cost_estimate=cost,
    )(*inputs)

    out = out[:, :, :N_valid].reshape(B, O, Ho, Wp)[:, :, :, :Wo]
    return out


def style_block_reference(x, w_lat, stochastic_noise, params, *, kernel_size,
                          padding, demod=True, add_noise=True, eps=1e-8,
                          neg_slope=0.2):
    """Pure-JAX (f32) reference matching PyTorch StyleBlock.forward semantics."""
    B, I, H, W = x.shape
    K = kernel_size
    O = params["conv_w"].shape[0]
    w_dim = w_lat.shape[1]

    # EqualLinear
    a_scale = 1.0 / jnp.sqrt(jnp.float32(w_dim))
    scores = w_lat @ (params["a_w"] * a_scale).T + params["a_b"]       # (B, I)

    # ModulatedConv2D
    conv_scale = 1.0 / jnp.sqrt(jnp.float32(I * K * K))
    wt = params["conv_w"] * conv_scale                                 # (O, I, K, K)
    wmod = wt[None] * scores[:, None, :, None, None]                   # (B, O, I, K, K)
    if demod:
        d = jax.lax.rsqrt(jnp.sum(wmod ** 2, axis=(2, 3, 4), keepdims=True) + eps)
        wmod = wmod * d
    xg = x.reshape(1, B * I, H, W)
    wg = wmod.reshape(B * O, I, K, K)
    y = jax.lax.conv_general_dilated(
        xg, wg, window_strides=(1, 1),
        padding=[(padding, padding), (padding, padding)],
        dimension_numbers=("NCHW", "OIHW", "NCHW"),
        feature_group_count=B)
    Ho, Wo = y.shape[2], y.shape[3]
    y = y.reshape(B, O, Ho, Wo)

    if add_noise:
        noise = stochastic_noise[:, :1, :Ho, :Wo] * params["scale_noise"][None, :, None, None]
        y = noise + y
    y = y + params["bias"].reshape(1, -1, 1, 1)
    return jnp.where(y > 0, y, neg_slope * y)


if __name__ == "__main__":
    B, I, O = 2, 4, 8
    H = W = 16
    K, PAD = 3, 1
    W_DIM = 32
    FULL_H = FULL_W = 32

    key = jax.random.PRNGKey(0)
    k = jax.random.split(key, 6)

    x = jax.random.normal(k[0], (B, I, H, W), jnp.float32)
    w_lat = jax.random.normal(k[1], (B, W_DIM), jnp.float32)
    stochastic_noise = jax.random.normal(k[2], (B, 1, FULL_H, FULL_W), jnp.float32)

    # PyTorch __init__ zero-inits scale_noise/bias; use non-trivial values here
    # so every code path is exercised.
    params = {
        "conv_w": jax.random.normal(k[3], (O, I, K, K), jnp.float32),  # ModulatedConv2D
        "a_w": jax.random.normal(k[4], (I, W_DIM), jnp.float32),       # EqualLinear weight
        "a_b": jnp.ones((I,), jnp.float32),                            # EqualLinear bias (=1)
        "bias": 0.1 * jax.random.normal(k[5], (O,), jnp.float32),      # StyleBlock bias
        "scale_noise": 0.5 * jnp.ones((1,), jnp.float32),              # AdditiveNoiseBlock
    }

    configs = [
        # multi HW-tile path (NT = 3), f32 output, wmod cached across tiles
        dict(demod=True, add_noise=True, tile_n=128, out_dtype=jnp.float32),
        # single-tile path, no noise DMA, bf16 output
        dict(demod=False, add_noise=False, tile_n=1024, out_dtype=jnp.bfloat16),
    ]
    for cfg in configs:
        noise_arg = stochastic_noise if cfg["add_noise"] else None
        out = style_block_forward(x, w_lat, noise_arg, params,
                                  kernel_size=K, padding=PAD, eps=1e-8, **cfg)
        out = jax.block_until_ready(out)

        ref = style_block_reference(x, w_lat, stochastic_noise, params,
                                    kernel_size=K, padding=PAD, eps=1e-8,
                                    demod=cfg["demod"], add_noise=cfg["add_noise"])
        ref = jax.block_until_ready(ref)

        assert out.shape == (B, O, H, W), out.shape
        max_err = float(jnp.max(jnp.abs(out.astype(jnp.float32) - ref)))
        # bf16 weights/activations/output (f32 accumulation) -> loosened tolerance.
        tol = 3e-2 * max(1.0, float(jnp.max(jnp.abs(ref))))
        assert max_err < tol, f"cfg={cfg}: max abs err {max_err} (tol {tol})"

    print("KERNEL_OK")
</pallas_src>

<mosaic_0001>
module attributes {stable_mosaic.version = 11 : i64} {
  func.func @_style_block_kernel(%arg0: i32, %arg1: i32, %arg2: memref<1x1x32xf32, #tpu.memory_space<vmem>>, %arg3: memref<32x4xf32, #tpu.memory_space<vmem>>, %arg4: memref<1x4xf32, #tpu.memory_space<vmem>>, %arg5: memref<9x8x4xbf16, #tpu.memory_space<vmem>>, %arg6: memref<1x1x4x166xbf16, #tpu.memory_space<vmem>>, %arg7: memref<8x1xf32, #tpu.memory_space<vmem>>, %arg8: memref<1x1x128xbf16, #tpu.memory_space<vmem>>, %arg9: memref<1xf32, #tpu.memory_space<smem>>, %arg10: memref<1x8x128xf32, #tpu.memory_space<vmem>>, %arg11: memref<8x36xbf16, #tpu.memory_space<vmem>>, %arg12: memref<36x128xbf16, #tpu.memory_space<vmem>>) attributes {dimension_semantics = [#tpu.dimension_semantics<parallel>, #tpu.dimension_semantics<arbitrary>], iteration_bounds = array<i64: 2, 3>, scalar_prefetch = 0 : i64, scratch_operands = 2 : i64, tpu.core_type = #tpu.core_type<tc>, window_params = [{transform_indices = @transform_0, window_bounds = array<i64: 1, 1, 32>}, {pipeline_mode = #tpu.pipeline_mode<synchronous>, transform_indices = @transform_1, window_bounds = array<i64: 32, 4>}, {pipeline_mode = #tpu.pipeline_mode<synchronous>, transform_indices = @transform_2, window_bounds = array<i64: 1, 4>}, {pipeline_mode = #tpu.pipeline_mode<synchronous>, transform_indices = @transform_3, window_bounds = array<i64: 9, 8, 4>}, {transform_indices = @transform_4, window_bounds = array<i64: 1, 1, 4, 166>}, {pipeline_mode = #tpu.pipeline_mode<synchronous>, transform_indices = @transform_5, window_bounds = array<i64: 8, 1>}, {transform_indices = @transform_6, window_bounds = array<i64: 1, 1, 128>}, {transform_indices = @transform_7, window_bounds = array<i64: 1>}, {transform_indices = @transform_8, window_bounds = array<i64: 1, 8, 128>}]} {
    %c0_i32 = arith.constant 0 : i32
    %0 = arith.cmpi eq, %arg1, %c0_i32 : i32
    %1 = arith.extui %0 : i1 to i32
    %c0_i32_0 = arith.constant 0 : i32
    %2 = arith.cmpi ne, %1, %c0_i32_0 : i32
    scf.if %2 {
      %c0_54 = arith.constant 0 : index
      %c0_55 = arith.constant 0 : index
      %c0_56 = arith.constant 0 : index
      %52 = vector.load %arg2[%c0_54, %c0_55, %c0_56] : memref<1x1x32xf32, #tpu.memory_space<vmem>>, vector<1x1x32xf32>
      %53 = vector.shape_cast %52 : vector<1x1x32xf32> to vector<1x32xf32>
      %c0_57 = arith.constant 0 : index
      %c0_58 = arith.constant 0 : index
      %54 = vector.load %arg3[%c0_57, %c0_58] : memref<32x4xf32, #tpu.memory_space<vmem>>, vector<32x4xf32>
      %cst_59 = arith.constant dense<0.000000e+00> : vector<1x4xf32>
      %55 = tpu.matmul %53, %54, %cst_59 {dimension_numbers = #tpu.dot_dimension_numbers<[1], [0], [0], [1], [0, 0, 1, 1], [], []>} : vector<1x32xf32>, vector<32x4xf32>, vector<1x4xf32> -> vector<1x4xf32>
      %c0_60 = arith.constant 0 : index
      %c0_61 = arith.constant 0 : index
      %56 = vector.load %arg4[%c0_60, %c0_61] : memref<1x4xf32, #tpu.memory_space<vmem>>, vector<1x4xf32>
      %57 = arith.addf %55, %56 : vector<1x4xf32>
      %c0_62 = arith.constant 0 : index
      %c0_63 = arith.constant 0 : index
      %c0_64 = arith.constant 0 : index
      %58 = vector.load %arg5[%c0_62, %c0_63, %c0_64] : memref<9x8x4xbf16, #tpu.memory_space<vmem>>, vector<9x8x4xbf16>
      %59 = arith.extf %58 : vector<9x8x4xbf16> to vector<9x8x4xf32>
      %60 = vector.shape_cast %57 : vector<1x4xf32> to vector<1x1x4xf32>
      %61 = vector.broadcast %60 : vector<1x1x4xf32> to vector<9x8x4xf32>
      %62 = arith.mulf %59, %61 : vector<9x8x4xf32>
      %63 = arith.mulf %62, %62 : vector<9x8x4xf32>
      %cst_65 = arith.constant dense<0.000000e+00> : vector<8xf32>
      %64 = vector.multi_reduction <add>, %63, %cst_65 [0, 2] : vector<9x8x4xf32> to vector<8xf32>
      %65 = vector.shape_cast %64 : vector<8xf32> to vector<1x8x1xf32>
      %cst_66 = arith.constant 9.99999993E-9 : f32
      %66 = vector.broadcast %cst_66 : f32 to vector<1x8x1xf32>
      %67 = arith.addf %65, %66 : vector<1x8x1xf32>
      %68 = math.rsqrt %67 : vector<1x8x1xf32>
      %69 = vector.broadcast %68 : vector<1x8x1xf32> to vector<9x8x4xf32>
      %70 = arith.mulf %62, %69 : vector<9x8x4xf32>
      %71 = arith.truncf %70 : vector<9x8x4xf32> to vector<9x8x4xbf16>
      %72 = vector.extract_strided_slice %71 {offsets = [0, 0, 0], sizes = [1, 8, 4], strides = [1, 1, 1]} : vector<9x8x4xbf16> to vector<1x8x4xbf16>
      %73 = vector.shape_cast %72 : vector<1x8x4xbf16> to vector<8x4xbf16>
      %c0_67 = arith.constant 0 : index
      %c0_68 = arith.constant 0 : index
      %74 = vector.load %arg11[%c0_67, %c0_68] : memref<8x36xbf16, #tpu.memory_space<vmem>>, vector<8x4xbf16>
      tpu.vector_store %arg11[%c0_67, %c0_68], %73 {strides = array<i32>} : memref<8x36xbf16, #tpu.memory_space<vmem>>, vector<8x4xbf16>,
      %75 = vector.extract_strided_slice %71 {offsets = [1, 0, 0], sizes = [1, 8, 4], strides = [1, 1, 1]} : vector<9x8x4xbf16> to vector<1x8x4xbf16>
      %76 = vector.shape_cast %75 : vector<1x8x4xbf16> to vector<8x4xbf16>
      %c0_69 = arith.constant 0 : index
      %c4_70 = arith.constant 4 : index
      %77 = vector.load %arg11[%c0_69, %c4_70] : memref<8x36xbf16, #tpu.memory_space<vmem>>, vector<8x4xbf16>
      tpu.vector_store %arg11[%c0_69, %c4_70], %76 {strides = array<i32>} : memref<8x36xbf16, #tpu.memory_space<vmem>>, vector<8x4xbf16>,
      %78 = vector.extract_strided_slice %71 {offsets = [2, 0, 0], sizes = [1, 8, 4], strides = [1, 1, 1]} : vector<9x8x4xbf16> to vector<1x8x4xbf16>
      %79 = vector.shape_cast %78 : vector<1x8x4xbf16> to vector<8x4xbf16>
      %c0_71 = arith.constant 0 : index
      %c8_72 = arith.constant 8 : index
      %80 = vector.load %arg11[%c0_71, %c8_72] : memref<8x36xbf16, #tpu.memory_space<vmem>>, vector<8x4xbf16>
      tpu.vector_store %arg11[%c0_71, %c8_72], %79 {strides = array<i32>} : memref<8x36xbf16, #tpu.memory_space<vmem>>, vector<8x4xbf16>,
      %81 = vector.extract_strided_slice %71 {offsets = [3, 0, 0], sizes = [1, 8, 4], strides = [1, 1, 1]} : vector<9x8x4xbf16> to vector<1x8x4xbf16>
      %82 = vector.shape_cast %81 : vector<1x8x4xbf16> to vector<8x4xbf16>
      %c0_73 = arith.constant 0 : index
      %c12_74 = arith.constant 12 : index
      %83 = vector.load %arg11[%c0_73, %c12_74] : memref<8x36xbf16, #tpu.memory_space<vmem>>, vector<8x4xbf16>
      tpu.vector_store %arg11[%c0_73, %c12_74], %82 {strides = array<i32>} : memref<8x36xbf16, #tpu.memory_space<vmem>>, vector<8x4xbf16>,
      %84 = vector.extract_strided_slice %71 {offsets = [4, 0, 0], sizes = [1, 8, 4], strides = [1, 1, 1]} : vector<9x8x4xbf16> to vector<1x8x4xbf16>
      %85 = vector.shape_cast %84 : vector<1x8x4xbf16> to vector<8x4xbf16>
      %c0_75 = arith.constant 0 : index
      %c16_76 = arith.constant 16 : index
      %86 = vector.load %arg11[%c0_75, %c16_76] : memref<8x36xbf16, #tpu.memory_space<vmem>>, vector<8x4xbf16>
      tpu.vector_store %arg11[%c0_75, %c16_76], %85 {strides = array<i32>} : memref<8x36xbf16, #tpu.memory_space<vmem>>, vector<8x4xbf16>,
      %87 = vector.extract_strided_slice %71 {offsets = [5, 0, 0], sizes = [1, 8, 4], strides = [1, 1, 1]} : vector<9x8x4xbf16> to vector<1x8x4xbf16>
      %88 = vector.shape_cast %87 : vector<1x8x4xbf16> to vector<8x4xbf16>
      %c0_77 = arith.constant 0 : index
      %c20_78 = arith.constant 20 : index
      %89 = vector.load %arg11[%c0_77, %c20_78] : memref<8x36xbf16, #tpu.memory_space<vmem>>, vector<8x4xbf16>
      tpu.vector_store %arg11[%c0_77, %c20_78], %88 {strides = array<i32>} : memref<8x36xbf16, #tpu.memory_space<vmem>>, vector<8x4xbf16>,
      %90 = vector.extract_strided_slice %71 {offsets = [6, 0, 0], sizes = [1, 8, 4], strides = [1, 1, 1]} : vector<9x8x4xbf16> to vector<1x8x4xbf16>
      %91 = vector.shape_cast %90 : vector<1x8x4xbf16> to vector<8x4xbf16>
      %c0_79 = arith.constant 0 : index
      %c24_80 = arith.constant 24 : index
      %92 = vector.load %arg11[%c0_79, %c24_80] : memref<8x36xbf16, #tpu.memory_space<vmem>>, vector<8x4xbf16>
      tpu.vector_store %arg11[%c0_79, %c24_80], %91 {strides = array<i32>} : memref<8x36xbf16, #tpu.memory_space<vmem>>, vector<8x4xbf16>,
      %93 = vector.extract_strided_slice %71 {offsets = [7, 0, 0], sizes = [1, 8, 4], strides = [1, 1, 1]} : vector<9x8x4xbf16> to vector<1x8x4xbf16>
      %94 = vector.shape_cast %93 : vector<1x8x4xbf16> to vector<8x4xbf16>
      %c0_81 = arith.constant 0 : index
      %c28_82 = arith.constant 28 : index
      %95 = vector.load %arg11[%c0_81, %c28_82] : memref<8x36xbf16, #tpu.memory_space<vmem>>, vector<8x4xbf16>
      tpu.vector_store %arg11[%c0_81, %c28_82], %94 {strides = array<i32>} : memref<8x36xbf16, #tpu.memory_space<vmem>>, vector<8x4xbf16>,
      %96 = vector.extract_strided_slice %71 {offsets = [8, 0, 0], sizes = [1, 8, 4], strides = [1, 1, 1]} : vector<9x8x4xbf16> to vector<1x8x4xbf16>
      %97 = vector.shape_cast %96 : vector<1x8x4xbf16> to vector<8x4xbf16>
      %c0_83 = arith.constant 0 : index
      %c32_84 = arith.constant 32 : index
      %98 = vector.load %arg11[%c0_83, %c32_84] : memref<8x36xbf16, #tpu.memory_space<vmem>>, vector<8x4xbf16>
      tpu.vector_store %arg11[%c0_83, %c32_84], %97 {strides = array<i32>} : memref<8x36xbf16, #tpu.memory_space<vmem>>, vector<8x4xbf16>,
    } else {
    }
    %c0 = arith.constant 0 : index
    %c0_1 = arith.constant 0 : index
    %c0_2 = arith.constant 0 : index
    %c0_3 = arith.constant 0 : index
    %3 = vector.load %arg6[%c0, %c0_1, %c0_2, %c0_3] : memref<1x1x4x166xbf16, #tpu.memory_space<vmem>>, vector<1x1x4x128xbf16>
    %4 = vector.shape_cast %3 : vector<1x1x4x128xbf16> to vector<4x128xbf16>
    %c0_4 = arith.constant 0 : index
    %c0_5 = arith.constant 0 : index
    %5 = vector.load %arg12[%c0_4, %c0_5] : memref<36x128xbf16, #tpu.memory_space<vmem>>, vector<4x128xbf16>
    tpu.vector_store %arg12[%c0_4, %c0_5], %4 {strides = array<i32>} : memref<36x128xbf16, #tpu.memory_space<vmem>>, vector<4x128xbf16>,
    %c0_6 = arith.constant 0 : index
    %c0_7 = arith.constant 0 : index
    %c0_8 = arith.constant 0 : index
    %c1 = arith.constant 1 : index
    %6 = vector.load %arg6[%c0_6, %c0_7, %c0_8, %c1] : memref<1x1x4x166xbf16, #tpu.memory_space<vmem>>, vector<1x1x4x128xbf16>
    %7 = vector.shape_cast %6 : vector<1x1x4x128xbf16> to vector<4x128xbf16>
    %c4 = arith.constant 4 : index
    %c0_9 = arith.constant 0 : index
    %8 = vector.load %arg12[%c4, %c0_9] : memref<36x128xbf16, #tpu.memory_space<vmem>>, vector<4x128xbf16>
    tpu.vector_store %arg12[%c4, %c0_9], %7 {strides = array<i32>} : memref<36x128xbf16, #tpu.memory_space<vmem>>, vector<4x128xbf16>,
    %c0_10 = arith.constant 0 : index
    %c0_11 = arith.constant 0 : index
    %c0_12 = arith.constant 0 : index
    %c2 = arith.constant 2 : index
    %9 = vector.load %arg6[%c0_10, %c0_11, %c0_12, %c2] : memref<1x1x4x166xbf16, #tpu.memory_space<vmem>>, vector<1x1x4x128xbf16>
    %10 = vector.shape_cast %9 : vector<1x1x4x128xbf16> to vector<4x128xbf16>
    %c8 = arith.constant 8 : index
    %c0_13 = arith.constant 0 : index
    %11 = vector.load %arg12[%c8, %c0_13] : memref<36x128xbf16, #tpu.memory_space<vmem>>, vector<4x128xbf16>
    tpu.vector_store %arg12[%c8, %c0_13], %10 {strides = array<i32>} : memref<36x128xbf16, #tpu.memory_space<vmem>>, vector<4x128xbf16>,
    %c0_14 = arith.constant 0 : index
    %c0_15 = arith.constant 0 : index
    %c0_16 = arith.constant 0 : index
    %c18 = arith.constant 18 : index
    %12 = vector.load %arg6[%c0_14, %c0_15, %c0_16, %c18] : memref<1x1x4x166xbf16, #tpu.memory_space<vmem>>, vector<1x1x4x128xbf16>
    %13 = vector.shape_cast %12 : vector<1x1x4x128xbf16> to vector<4x128xbf16>
    %c12 = arith.constant 12 : index
    %c0_17 = arith.constant 0 : index
    %14 = vector.load %arg12[%c12, %c0_17] : memref<36x128xbf16, #tpu.memory_space<vmem>>, vector<4x128xbf16>
    tpu.vector_store %arg12[%c12, %c0_17], %13 {strides = array<i32>} : memref<36x128xbf16, #tpu.memory_space<vmem>>, vector<4x128xbf16>,
    %c0_18 = arith.constant 0 : index
    %c0_19 = arith.constant 0 : index
    %c0_20 = arith.constant 0 : index
    %c19 = arith.constant 19 : index
    %15 = vector.load %arg6[%c0_18, %c0_19, %c0_20, %c19] : memref<1x1x4x166xbf16, #tpu.memory_space<vmem>>, vector<1x1x4x128xbf16>
    %16 = vector.shape_cast %15 : vector<1x1x4x128xbf16> to vector<4x128xbf16>
    %c16 = arith.constant 16 : index
    %c0_21 = arith.constant 0 : index
    %17 = vector.load %arg12[%c16, %c0_21] : memref<36x128xbf16, #tpu.memory_space<vmem>>, vector<4x128xbf16>
    tpu.vector_store %arg12[%c16, %c0_21], %16 {strides = array<i32>} : memref<36x128xbf16, #tpu.memory_space<vmem>>, vector<4x128xbf16>,
    %c0_22 = arith.constant 0 : index
    %c0_23 = arith.constant 0 : index
    %c0_24 = arith.constant 0 : index
    %c20 = arith.constant 20 : index
    %18 = vector.load %arg6[%c0_22, %c0_23, %c0_24, %c20] : memref<1x1x4x166xbf16, #tpu.memory_space<vmem>>, vector<1x1x4x128xbf16>
    %19 = vector.shape_cast %18 : vector<1x1x4x128xbf16> to vector<4x128xbf16>
    %c20_25 = arith.constant 20 : index
    %c0_26 = arith.constant 0 : index
    %20 = vector.load %arg12[%c20_25, %c0_26] : memref<36x128xbf16, #tpu.memory_space<vmem>>, vector<4x128xbf16>
    tpu.vector_store %arg12[%c20_25, %c0_26], %19 {strides = array<i32>} : memref<36x128xbf16, #tpu.memory_space<vmem>>, vector<4x128xbf16>,
    %c0_27 = arith.constant 0 : index
    %c0_28 = arith.constant 0 : index
    %c0_29 = arith.constant 0 : index
    %c36 = arith.constant 36 : index
    %21 = vector.load %arg6[%c0_27, %c0_28, %c0_29, %c36] : memref<1x1x4x166xbf16, #tpu.memory_space<vmem>>, vector<1x1x4x128xbf16>
    %22 = vector.shape_cast %21 : vector<1x1x4x128xbf16> to vector<4x128xbf16>
    %c24 = arith.constant 24 : index
    %c0_30 = arith.constant 0 : index
    %23 = vector.load %arg12[%c24, %c0_30] : memref<36x128xbf16, #tpu.memory_space<vmem>>, vector<4x128xbf16>
    tpu.vector_store %arg12[%c24, %c0_30], %22 {strides = array<i32>} : memref<36x128xbf16, #tpu.memory_space<vmem>>, vector<4x128xbf16>,
    %c0_31 = arith.constant 0 : index
    %c0_32 = arith.constant 0 : index
    %c0_33 = arith.constant 0 : index
    %c37 = arith.constant 37 : index
    %24 = vector.load %arg6[%c0_31, %c0_32, %c0_33, %c37] : memref<1x1x4x166xbf16, #tpu.memory_space<vmem>>, vector<1x1x4x128xbf16>
    %25 = vector.shape_cast %24 : vector<1x1x4x128xbf16> to vector<4x128xbf16>
    %c28 = arith.constant 28 : index
    %c0_34 = arith.constant 0 : index
    %26 = vector.load %arg12[%c28, %c0_34] : memref<36x128xbf16, #tpu.memory_space<vmem>>, vector<4x128xbf16>
    tpu.vector_store %arg12[%c28, %c0_34], %25 {strides = array<i32>} : memref<36x128xbf16, #tpu.memory_space<vmem>>, vector<4x128xbf16>,
    %c0_35 = arith.constant 0 : index
    %c0_36 = arith.constant 0 : index
    %c0_37 = arith.constant 0 : index
    %c38 = arith.constant 38 : index
    %27 = vector.load %arg6[%c0_35, %c0_36, %c0_37, %c38] : memref<1x1x4x166xbf16, #tpu.memory_space<vmem>>, vector<1x1x4x128xbf16>
    %28 = vector.shape_cast %27 : vector<1x1x4x128xbf16> to vector<4x128xbf16>
    %c32 = arith.constant 32 : index
    %c0_38 = arith.constant 0 : index
    %29 = vector.load %arg12[%c32, %c0_38] : memref<36x128xbf16, #tpu.memory_space<vmem>>, vector<4x128xbf16>
    tpu.vector_store %arg12[%c32, %c0_38], %28 {strides = array<i32>} : memref<36x128xbf16, #tpu.memory_space<vmem>>, vector<4x128xbf16>,
    %c0_39 = arith.constant 0 : index
    %c0_40 = arith.constant 0 : index
    %30 = vector.load %arg11[%c0_39, %c0_40] : memref<8x36xbf16, #tpu.memory_space<vmem>>, vector<8x36xbf16>
    %c0_41 = arith.constant 0 : index
    %c0_42 = arith.constant 0 : index
    %31 = vector.load %arg12[%c0_41, %c0_42] : memref<36x128xbf16, #tpu.memory_space<vmem>>, vector<36x128xbf16>
    %cst = arith.constant dense<0.000000e+00> : vector<8x128xf32>
    %32 = tpu.matmul %30, %31, %cst {dimension_numbers = #tpu.dot_dimension_numbers<[1], [0], [0], [1], [0, 0, 1, 1], [], []>} : vector<8x36xbf16>, vector<36x128xbf16>, vector<8x128xf32> -> vector<8x128xf32>
    %c0_43 = arith.constant 0 : index
    %33 = memref.load %arg9[%c0_43] : memref<1xf32, #tpu.memory_space<smem>>
    %c0_44 = arith.constant 0 : index
    %c0_45 = arith.constant 0 : index
    %c0_46 = arith.constant 0 : index
    %34 = vector.load %arg8[%c0_44, %c0_45, %c0_46] : memref<1x1x128xbf16, #tpu.memory_space<vmem>>, vector<1x1x128xbf16>
    %35 = vector.shape_cast %34 : vector<1x1x128xbf16> to vector<1x128xbf16>
    %36 = arith.extf %35 : vector<1x128xbf16> to vector<1x128xf32>
    %37 = vector.broadcast %33 : f32 to vector<1x128xf32>
    %38 = arith.mulf %37, %36 : vector<1x128xf32>
    %39 = vector.broadcast %38 : vector<1x128xf32> to vector<8x128xf32>
    %40 = arith.addf %32, %39 : vector<8x128xf32>
    %c0_47 = arith.constant 0 : index
    %c0_48 = arith.constant 0 : index
    %41 = vector.load %arg7[%c0_47, %c0_48] : memref<8x1xf32, #tpu.memory_space<vmem>>, vector<8x1xf32>
    %42 = vector.broadcast %41 : vector<8x1xf32> to vector<8x128xf32>
    %43 = arith.addf %40, %42 : vector<8x128xf32>
    %cst_49 = arith.constant 0.000000e+00 : f32
    %44 = vector.broadcast %cst_49 : f32 to vector<8x128xf32>
    %45 = arith.cmpf ogt, %43, %44 : vector<8x128xf32>
    %cst_50 = arith.constant 2.000000e-01 : f32
    %46 = vector.broadcast %cst_50 : f32 to vector<8x128xf32>
    %47 = arith.mulf %46, %43 : vector<8x128xf32>
    %48 = arith.select %45, %43, %47 : vector<8x128xi1>, vector<8x128xf32>
    %c0_51 = arith.constant 0 : index
    %c0_52 = arith.constant 0 : index
    %c0_53 = arith.constant 0 : index
    %49 = vector.load %arg10[%c0_51, %c0_52, %c0_53] : memref<1x8x128xf32, #tpu.memory_space<vmem>>, vector<1x8x128xf32>
    %50 = vector.shape_cast %49 : vector<1x8x128xf32> to vector<8x128xf32>
    %51 = vector.shape_cast %48 : vector<8x128xf32> to vector<1x8x128xf32>
    tpu.vector_store %arg10[%c0_51, %c0_52, %c0_53], %51 {strides = array<i32>} : memref<1x8x128xf32, #tpu.memory_space<vmem>>, vector<1x8x128xf32>,
    return
  }
  func.func @transform_0(%arg0: i32, %arg1: i32) -> (i32, i32, i32) {
    %c0_i32 = arith.constant 0 : i32
    %c0_i32_0 = arith.constant 0 : i32
    %c0_i32_1 = arith.constant 0 : i32
    return %arg0, %c0_i32, %c0_i32_0 : i32, i32, i32
  }
  func.func @transform_1(%arg0: i32, %arg1: i32) -> (i32, i32) {
    %c0_i32 = arith.constant 0 : i32
    %c0_i32_0 = arith.constant 0 : i32
    %c0_i32_1 = arith.constant 0 : i32
    return %c0_i32, %c0_i32_0 : i32, i32
  }
  func.func @transform_2(%arg0: i32, %arg1: i32) -> (i32, i32) {
    %c0_i32 = arith.constant 0 : i32
    %c0_i32_0 = arith.constant 0 : i32
    %c0_i32_1 = arith.constant 0 : i32
    return %c0_i32, %c0_i32_0 : i32, i32
  }
  func.func @transform_3(%arg0: i32, %arg1: i32) -> (i32, i32, i32) {
    %c0_i32 = arith.constant 0 : i32
    %c0_i32_0 = arith.constant 0 : i32
    %c0_i32_1 = arith.constant 0 : i32
    %c0_i32_2 = arith.constant 0 : i32
    return %c0_i32, %c0_i32_0, %c0_i32_1 : i32, i32, i32
  }
  func.func @transform_4(%arg0: i32, %arg1: i32) -> (i32, i32, i32, i32) {
    %c0_i32 = arith.constant 0 : i32
    %c0_i32_0 = arith.constant 0 : i32
    %c0_i32_1 = arith.constant 0 : i32
    return %arg0, %arg1, %c0_i32, %c0_i32_0 : i32, i32, i32, i32
  }
  func.func @transform_5(%arg0: i32, %arg1: i32) -> (i32, i32) {
    %c0_i32 = arith.constant 0 : i32
    %c0_i32_0 = arith.constant 0 : i32
    %c0_i32_1 = arith.constant 0 : i32
    return %c0_i32, %c0_i32_0 : i32, i32
  }
  func.func @transform_6(%arg0: i32, %arg1: i32) -> (i32, i32, i32) {
    %c0_i32 = arith.constant 0 : i32
    %c0_i32_0 = arith.constant 0 : i32
    return %arg0, %c0_i32, %arg1 : i32, i32, i32
  }
  func.func @transform_7(%arg0: i32, %arg1: i32) -> i32 {
    %c0_i32 = arith.constant 0 : i32
    %c0_i32_0 = arith.constant 0 : i32
    return %c0_i32 : i32
  }
  func.func @transform_8(%arg0: i32, %arg1: i32) -> (i32, i32, i32) {
    %c0_i32 = arith.constant 0 : i32
    %c0_i32_0 = arith.constant 0 : i32
    return %arg0, %c0_i32, %arg1 : i32, i32, i32
  }
}

</mosaic_0001>

<bundles_post_ra>
// kernel: tpu_custom_call.1
= control target key start
LH: loop header
LB: loop body
LE: loop exit
PB: predicated region body
PF: predicated region fallthrough
CT: control target
= control target key end

     0   :  { %s1522_s0 = inlined_call_operand.vmem [shape: f32[2,1,32], index: 0, kind: input, shape index: {}]   ;;  %s1523_s1 = inlined_call_operand.vmem [shape: f32[32,4], index: 1, kind: input, shape index: {}]   ;;  %s1524_s2 = inlined_call_operand.vmem [shape: f32[1,4], index: 2, kind: input, shape index: {}]   ;;  %s1525_s3 = inlined_call_operand.vmem [shape: bf16[9,8,4], index: 3, kind: input, shape index: {}]   ;;  %s1526_s4 = inlined_call_operand.vmem [shape: bf16[2,3,4,166], index: 4, kind: input, shape index: {}]   ;;  %s1527_s5 = inlined_call_operand.vmem [shape: f32[8,1], index: 5, kind: input, shape index: {}]   ;;  %s1528_s6 = inlined_call_operand.vmem [shape: bf16[2,1,384], index: 6, kind: input, shape index: {}]   ;;  %s1529_s7 = inlined_call_operand.<no memory space> [shape: f32[1], index: 7, kind: input, shape index: {}]   ;;  %s1530_s8 = inlined_call_operand.hbm [shape: f32[2,8,384], index: 8, kind: output, shape index: {}]  }
   0x1   :  { %13 = sst [smem:[#allocation4]] %s1529_s7 }
   0x2   :  { %14 = vsyncpa [#allocation6], 0 }
   0x3   :  { %16 = vsyncpa [#allocation6 + $0x1], 0  ;;  %s1308_s29 = smov 0   ;;  %s1310_s30 = smov 0  }
   0x4   :  { %s1312_s9 = smov 0   ;;  %s1314_s10 = smov 0  }
   0x5   :  { %s1316_s11 = smov 0   ;;  %s1318_s12 = smov 0  }
   0x6   :  { %s1320_s13 = smov 0   ;;  %s1322_s14 = smov 0  }
   0x7 LB: > { %1541 = sst [smem:[#allocation8_spill]] %s1207_s29  ;;  %s950_s7 = sadd.s32 4294967295, %s1235_s14   ;;  %s1235_s14 = sphi %s1322_s14, %s22_s14   ;;  %s1231_s13 = sphi %s1320_s13, %s1561_s13   ;;  %s1227_s12 = sphi %s1318_s12, %s1560_s12   ;;  %s1223_s11 = sphi %s1316_s11, %s1559_s11   ;;  %s1219_s10 = sphi %s1314_s10, %s1558_s10   ;;  %s1215_s9 = sphi %s1312_s9, %s1557_s9   ;;  %s1211_s30 = sphi %s1310_s30, %s1563_s30   ;;  %s1207_s29 = sphi %s1308_s29, %s1562_s29  }
   0x8   : > { %1542 = sst [smem:[#allocation9_spill]] %s1215_s9  ;;  %s951_s15 = sadd.s32 4294967294, %s1235_s14  }
   0x9   : > { %1543 = sst [smem:[#allocation10_spill]] %s1227_s12  ;;  %s31_s16 = sadd.s32 1, %s1227_s12 }
   0xa   : > { %1544 = sst [smem:[#allocation11_spill]] %s1231_s13  ;;  %p32_p0 = scmp.ge.s32.totalorder %s31_s16, 3 }
   0xb   : > { %1545 = sst [smem:[#allocation12_spill]] %s1235_s14  ;;  %s34_s17 = sadd.s32 1, %s1231_s13 }
   0xc   : > { %p240_p1 = scmp.ne.s32.totalorder %s1215_s9, %s1211_s30  ;;  %p241_p2 = scmp.eq.s32.totalorder %s950_s7, 5 }
   0xd   : > { %s1565_s16 = smov (%p32_p0, %s31_s16), 0  ;;  %s1567_s17 = smov (!%p32_p0, %s34_s17), %s1231_s13 }
   0xe   : > { %1546 = sst [smem:[#allocation13_spill]] %s1565_s16  ;;  %s226_s18 = ssub.s32 %s1227_s12, %s1565_s16 }
   0xf   : > { %p1359_p3 = por %p241_p2, %p240_p1  ;;  %p36_p4 = scmp.ge.s32.totalorder %s1567_s17, 2 }
  0x10   : > { %p246_p5 = scmp.ne.s32.totalorder %s1211_s30, %s1207_s29  ;;  %p247_p6 = scmp.eq.s32.totalorder %s951_s15, 5 }
  0x11   : > { %p954_p7 = scmp.ge.s32.totalorder %s1235_s14, 1  ;;  %s1569_s17 = smov (%p36_p4, %s1567_s17), 0 }
  0x12   : > { %1548 = sst [smem:[#allocation14_spill]] %s1569_s17  ;;  %p1368_p8 = por %p247_p6, %p246_p5 }
  0x13   : > { %p308_p9 = scmp.lt.s32.totalorder %s1235_s14, 7  ;;  %s225_s21 = ssub.s32 %s1231_s13, %s1569_s17 }
  0x14   : > { %s1549_s20 = scalar_select %p1368_p8, 1, 0 }
  0x15   : > { %s230_s22 = sadd.s32 1, %s1215_s9  ;;  %s227_s23 = sor.u32 %s226_s18, %s225_s21 }
  0x16   : > { %1550 = sst [smem:[#allocation15_spill]] %s1549_s20  ;;  %p309_p10 = pnand %p954_p7, %p308_p9 }
  0x17   : > { %p228_p11 = scmp.eq.s32.totalorder %s227_s23, 0  ;;  %s1535_s25 = sand.u32 (!%p309_p10), 1, %s1211_s30  }
  0x18   : > { %312 = sbr.rel (%p309_p10) target bundleno = 923 (0x39b), region = 52  ;;  %p356_p12 = scmp.lt.s32.totalorder (!%p309_p10), %s1223_s11, 1 }
  0x19   : > { %s1377_s24 = scalar_select %p228_p11, %s1215_s9, %s230_s22  }
  0x1a   : > { %s1383_s26 = sshll.u32 (!%p309_p10), %s1535_s25, 3  ;;  %p361_p13 = scmp.lt.s32.totalorder (!%p309_p10), %s1219_s10, 2 }
  0x1b   : > { %1551 = sst [smem:[#allocation16_spill]] %s1377_s24  ;;  %s355_s14 = scalar_lea.vmem (!%p309_p10), [#allocation5], %s1383_s26 }
  0x1c   : > { %p958_p0 = scmp.ne.s32.totalorder (!%p309_p10), %s1219_s10, 0 }
  0x1d   : > { %s357_s27 = scalar_select %p356_p12, %s1223_s11, 1 }
  0x1e   : > { %s362_s28 = scalar_select %p361_p13, %s1219_s10, 2 }
  0x1f   : > { %s358_s18 = scalar_lea.vmem %s1522_s0, %s357_s27  ;;  %s1037_s21 = smul.u32 6, %s357_s27 }
  0x20   : > { %s956_s22 = sshll.u32 %s362_s28, 1  ;;  %s1038_s23 = smul.u32 3, %s357_s27 }
  0x21   : > { %s365_s17 = sadd.s32 %s1037_s21, %s956_s22  ;;  %379 = sbr.rel (%p958_p0) target bundleno = 563 (0x233), region = 56 }
  0x22   : > { %s957_s16 = sshll.u32 %s365_s17, 1  ;;  %s1391_s13 = sadd.s32 %s1038_s23, %s362_s28 }
  0x23   : > { %s1396_s25 = scalar_lea.vmem %s1526_s4, %s957_s16  ;;  %s374_s29 = scalar_lea.vmem %s1528_s6, %s1391_s13 }
  0x24   : > { %s1239_s16 = smov (!%p958_p0), 8   ;;  %s1240_s20 = smov (!%p958_p0), 4  }
  0x25   : > { %s1241_s24 = smov (!%p958_p0), 12   ;;  %s1242_s15 = smov (!%p958_p0), 16  }
  0x26   : > { %v384_v0 = vld [vmem:[%s1523_s1 + $0x18] sm:$0xff]  ;;  %v1237_v1 = vmov 0.0   ;;  %v383_v2 = vld [vmem:[%s1523_s1 + $0x10] sm:$0xff]  ;;  %vm1238_vm0 = vmmov 0   ;;  %v382_v3 = vld [vmem:[%s1523_s1 + $0x8] sm:$0xff]  ;;  %vm386_vm1 = vcmask 261120   ;;  %v478_v6 = vlaneseq }
  0x27   : > { %1016 = vmatprep.subr.mxu0 %v1237_v1  ;;  %1024 = vmatprep.mubr.msk.f32.mxu0 %vm1238_vm0, %v1237_v1  ;;  %v381_v4 = vld [vmem:[%s1523_s1] sm:$0xff]  ;;  %v1004_v10 = vld [vmem:[%s1525_s3 + $0x8] sm:$0xff]   ;;  %v1005_v14 = vld [vmem:[%s1525_s3 + $0x10] sm:$0xff]   ;;  %vm500_vm2 = vcmask 31744   ;;  %vm540_vm3 = vcmask 27648   ;;  %s1243_s21 = smov 20  }
  0x28   : > { %1017 = vmatpush3.msra.mxu0 %v384_v0  ;;  %v380_v5 = vld [vmem:[%s358_s18] sm:$0x1]  ;;  %v479_v7 = vshrl.u32 %v478_v6, 7  ;;  %v994_v17 = vunpack.c.l.bf16 %v1004_v10  ;;  %v995_v18 = vunpack.c.h.bf16 %v1004_v10  ;;  %v998_v21 = vunpack.c.l.bf16 %v1005_v14  ;;  %v1006_v22 = vld [vmem:[%s1525_s3 + $0x18] sm:$0xff]   ;;  %s1244_s22 = smov 24   ;;  %s1245_s23 = smov 28  }
  0x29   : > { %1018 = vmatprep.subr.mxu0 %v1237_v1  ;;  %v989_v8 = vld [vmem:[%s1525_s3] sm:$0xff]   ;;  %v999_v23 = vunpack.c.h.bf16 %v1005_v14  ;;  %v1002_v28 = vunpack.c.l.bf16 %v1006_v22  ;;  %v1003_v33 = vunpack.c.h.bf16 %v1006_v22  ;;  %s1246_s7 = smov 32   ;;  %vm548_vm4 = vcmask 60448  }
  0x2a   : > { %1019 = vmatpush3.msra.mxu0 %v383_v2  ;;  %v385_v9 = vld [vmem:[%s1524_s2] sm:$0x1]  ;;  %v480_v11 = vsub.s32 0, %v479_v7  ;;  %v990_v13 = vunpack.c.l.bf16 %v989_v8  ;;  %v991_v16 = vunpack.c.h.bf16 %v989_v8  ;;  %vm556_vm5 = vcmask 93248  }
  0x2b   : > { %1020 = vmatprep.subr.mxu0 %v1237_v1  ;;  %v468_v34 = vld [vmem:[%s1525_s3 + $0x20] sm:$0xf]  ;;  %vm564_vm6 = vcmask 126048   ;;  %vm572_vm7 = vcmask 158848   ;;  %vm580_vm8 = vcmask 191648   ;;  %vm588_vm9 = vcmask 224448  }
  0x2c   : > { %1021 = vmatpush3.msra.mxu0 %v382_v3  ;;  %v477_v40 = vunpack.c.l.bf16 %v468_v34  ;;  %vm596_vm10 = vcmask 257248   ;;  %vm604_vm11 = vcmask 290048  }
  0x2d   : > { %1022 = vmatprep.subr.mxu0 %v1237_v1 }
  0x2e   : > { %1023 = vmatpush3.msra.mxu0 %v381_v4 }
  0x2f   : > { %1025 = vmatmul.mubr.msk.f32.vlgmr.msra.gmra.mxu0 %vm386_vm1, %v380_v5 }
  0xef   : > { %v456_v12 = vpop.f32.mrf.mxu0 }
  0xf0   : > { %v457_v15 = vadd.f32 %v456_v12, %v385_v9 }
  0xf1   : > { %v1026_v19 = vpop.f32.mrf.mxu0 }
  0xf2   : > { %v481_v20 = vrot.slane %v457_v15, %v480_v11 }
  0xf4   : > { %v482_v24 = vmul.f32 %v990_v13, %v481_v20  ;;  %v483_v25 = vmul.f32 %v991_v16, %v481_v20  ;;  %v484_v26 = vmul.f32 %v994_v17, %v481_v20  ;;  %v485_v27 = vmul.f32 %v995_v18, %v481_v20 }
  0xf5   : > { %v486_v29 = vmul.f32 %v998_v21, %v481_v20  ;;  %v487_v35 = vmul.f32 %v999_v23, %v481_v20  ;;  %v488_v41 = vmul.f32 %v1002_v28, %v481_v20  ;;  %v489_v45 = vmul.f32 %v1003_v33, %v481_v20 }
  0xf6   : > { %v491_v30 = vmul.f32 %v482_v24, %v482_v24  ;;  %v492_v31 = vmul.f32 %v483_v25, %v483_v25  ;;  %v493_v32 = vmul.f32 %v484_v26, %v484_v26  ;;  %v494_v36 = vmul.f32 %v485_v27, %v485_v27 }
  0xf7   : > { %v495_v42 = vmul.f32 %v486_v29, %v486_v29  ;;  %v496_v46 = vmul.f32 %v487_v35, %v487_v35  ;;  %v490_v49 = vmul.f32 %v481_v20, %v477_v40  ;;  %v497_v50 = vmul.f32 %v488_v41, %v488_v41 }
  0xf8   : > { %v501_v37 = vsel %vm500_vm2, %v491_v30, 0.0  ;;  %v502_v38 = vsel %vm500_vm2, %v492_v31, 0.0  ;;  %v504_v43 = vsel %vm500_vm2, %v493_v32, 0.0  ;;  %v506_v47 = vsel %vm500_vm2, %v494_v36, 0.0 }
  0xf9   : > { %v503_v39 = vadd.f32 %v502_v38, %v501_v37  ;;  %v508_v51 = vsel %vm500_vm2, %v495_v42, 0.0  ;;  %v498_v53 = vmul.f32 %v489_v45, %v489_v45  ;;  %v510_v54 = vsel %vm500_vm2, %v496_v46, 0.0 }
  0xfa   : > { %v499_v56 = vmul.f32 %v490_v49, %v490_v49  ;;  %v512_v57 = vsel %vm500_vm2, %v497_v50, 0.0 }
  0xfb   : > { %v505_v44 = vadd.f32 %v504_v43, %v503_v39  ;;  %v514_v59 = vsel %vm500_vm2, %v498_v53, 0.0 }
  0xfc   : > { %v516_v61 = vsel %vm500_vm2, %v499_v56, 0.0 }
  0xfd   : > { %v507_v48 = vadd.f32 %v506_v47, %v505_v44 }
  0xff   : > { %v509_v52 = vadd.f32 %v508_v51, %v507_v48 }
 0x101   : > { %v511_v55 = vadd.f32 %v510_v54, %v509_v52 }
 0x103   : > { %v513_v58 = vadd.f32 %v512_v57, %v511_v55 }
 0x105   : > { %v515_v60 = vadd.f32 %v514_v59, %v513_v58 }
 0x107   : > { %v517_v62 = vadd.f32 %v516_v61, %v515_v60 }
 0x109   : > { %518 = vadd.xlane.f32.xlu0 %v517_v62 }
 0x192   : > { %v519_v63 = vpop.xlane.xlu0 %518 }
 0x193   : > { %v520_v0 = vadd.f32 1e-08, %v519_v63 }
 0x195   : > { %1133 = vrsqrt.f32 %v520_v0 }
 0x1a2   : > { %v1134_v1 = vpop.eup %1133 }
 0x1a3   : > { %v524_v2 = vmul.f32 %v1134_v1, %v484_v26  ;;  %v523_v3 = vmul.f32 %v1134_v1, %v483_v25  ;;  %v525_v6 = vmul.f32 %v1134_v1, %v485_v27  ;;  %v522_v7 = vmul.f32 %v1134_v1, %v482_v24 }
 0x1a4   : > { %v526_v9 = vmul.f32 %v1134_v1, %v486_v29  ;;  %v527_v12 = vmul.f32 %v1134_v1, %v487_v35  ;;  %v528_v14 = vmul.f32 %v1134_v1, %v488_v41  ;;  %v529_v16 = vmul.f32 %v1134_v1, %v489_v45 }
 0x1a5   : > { %v981_v4 = vpack.c.bf16 %v524_v2, %v524_v2  ;;  %v980_v5 = vpack.c.bf16 %v523_v3, %v523_v3  ;;  %v982_v8 = vpack.c.bf16 %v525_v6, %v525_v6  ;;  %v531_v10 = vpack.c.bf16 %v522_v7, %v522_v7 }
 0x1a6   : > { %v983_v11 = vpack.c.bf16 %v526_v9, %v526_v9  ;;  %v984_v13 = vpack.c.bf16 %v527_v12, %v527_v12  ;;  %v985_v15 = vpack.c.bf16 %v528_v14, %v528_v14  ;;  %v986_v17 = vpack.c.bf16 %v529_v16, %v529_v16 }
 0x1a7   : > { %553 = vrot.lane.b32.xlu1 %v981_v4, %s1239_s16  ;;  %545 = vrot.lane.b32.xlu0 %v980_v5, %s1240_s20  ;;  %541 = vst.msk [vmem:[#allocation2] sm:$0xf] %vm540_vm3, %v531_v10  ;;  %v530_v18 = vmul.f32 %v1134_v1, %v490_v49 }
 0x1a9   : > { %v987_v19 = vpack.c.bf16 %v530_v18, %v530_v18 }
 0x1ab   : > { %561 = vrot.lane.b32.xlu1 %v982_v8, %s1241_s24 }
 0x1af   : > { %569 = vrot.lane.b32.xlu1 %v983_v11, %s1242_s15 }
 0x1b3   : > { %577 = vrot.lane.b32.xlu1 %v984_v13, %s1243_s21 }
 0x1b7   : > { %585 = vrot.lane.b32.xlu1 %v985_v15, %s1244_s22 }
 0x1bb   : > { %593 = vrot.lane.b32.xlu1 %v986_v17, %s1245_s23 }
 0x1bf   : > { %601 = vrot.lane.b32.xlu1 %v987_v19, %s1246_s7 }
 0x219   : > { %v554_v20 = vpop.permute.xlu1 %553  ;;  %v546_v21 = vpop.permute.xlu0 %545 }
 0x21a   : > { %549 = vst.msk [vmem:[#allocation2] sm:$0xf] %vm548_vm4, %v546_v21 }
 0x21b   : > { %557 = vst.msk [vmem:[#allocation2] sm:$0xf] %vm556_vm5, %v554_v20 }
 0x21d   : > { %v562_v22 = vpop.permute.xlu1 %561 }
 0x21e   : > { %565 = vst.msk [vmem:[#allocation2] sm:$0xf] %vm564_vm6, %v562_v22 }
 0x221   : > { %v570_v23 = vpop.permute.xlu1 %569 }
 0x222   : > { %573 = vst.msk [vmem:[#allocation2] sm:$0xf] %vm572_vm7, %v570_v23 }
 0x225   : > { %v578_v24 = vpop.permute.xlu1 %577 }
 0x226   : > { %581 = vst.msk [vmem:[#allocation2] sm:$0xf] %vm580_vm8, %v578_v24 }
 0x229   : > { %v586_v25 = vpop.permute.xlu1 %585 }
 0x22a   : > { %589 = vst.msk [vmem:[#allocation2] sm:$0xf] %vm588_vm9, %v586_v25 }
 0x22d   : > { %v594_v26 = vpop.permute.xlu1 %593 }
 0x22e   : > { %597 = vst.msk [vmem:[#allocation2] sm:$0xf] %vm596_vm10, %v594_v26 }
 0x231   : > { %v602_v27 = vpop.permute.xlu1 %601 }
 0x232   : > { %605 = vst.msk [vmem:[#allocation2] sm:$0xf] %vm604_vm11, %v602_v27 }
 0x233 PF: > { %v971_v28 = vld.sshfl [vmem:[%s1396_s25] sm:$0x33 pattern:$0x76325410]  ;;  %v614_v29 = vlaneseq  ;;  %s1247_s18 = smov 90   ;;  %s1248_s27 = smov 92  }
 0x234   : > { %733 = vrot.lane.b32.xlu0 %v971_v28, %s1247_s18  ;;  %700 = vrot.lane.b32.xlu1 %v971_v28, %s1248_s27  ;;  %v1249_v30 = vmov 1983009808   ;;  %v1136_v34 = vld [vmem:[%s1396_s25] ss:$0 sps:$4 sm:$0xff]   ;;  %s1250_s17 = smov 109   ;;  %v1251_v41 = vmov 0.0  }
 0x235   : > { %v612_v31 = vunpack.c.l.s4 %v1249_v30  ;;  %v1444_v32 = vshrl.u32 %v614_v29, 7  ;;  %v1137_v35 = vld [vmem:[%s1396_s25] ss:$0 sps:$4 sm:$0xff]   ;;  %1027 = vmatprep.subr.bf16.mxu0 %v1251_v41  ;;  %s1252_s28 = smov 91   ;;  %s1253_s9 = smov 108   ;;  %vm1257_vm12 = vmmov 0  }
 0x236   : > { %v1138_v37 = vld [vmem:[%s1396_s25] ss:$0 sps:$4 sm:$0xff]   ;;  %s1254_s12 = smov 127   ;;  %s1255_s16 = smov 126   ;;  %1033 = vmatprep.mubr.msk.bf16.mxu0 %vm1257_vm12, %v1251_v41  ;;  %v1258_v46 = vmov 0   ;;  %vm736_vm13 = vcmask 736256  }
 0x237   : > { %v613_v33 = vunpack.c.0.s8 %v612_v31  ;;  %v606_v38 = vld [vmem:[%s1396_s25] sm:$0x3]  ;;  %s1256_s20 = smov 110   ;;  %1135 = vset.pattern.permute.xlu0 %v1258_v46  ;;  %vm703_vm14 = vcmask 752640   ;;  %vm670_vm15 = vcmask 891904   ;;  %vm720_vm0 = vcmask 744448  }
 0x238   : > { %667 = vrot.lane.b32.xlu0 %v971_v28, %s1250_s17  ;;  %607 = vst [vmem:[#allocation3] sm:$0x3] %v606_v38  ;;  %v1139_v43 = vld [vmem:[%s1396_s25] ss:$0 sps:$4 sm:$0xff]   ;;  %vm687_vm1 = vcmask 883712   ;;  %vm774_vm2 = vcmask 1041408  }
 0x239   : > { %v616_v36 = vsub.s32 %v613_v33, %v1444_v32  ;;  %v818_v45 = vld [vmem:[%s1527_s5] sm:$0xff]  ;;  %vm621_vm3 = vcmask 1039360   ;;  %vm637_vm4 = vcmask 1031168   ;;  %vm654_vm5 = vcmask 900096   ;;  %s746_s25 = sld [smem:[#allocation4]]  ;;  %s1039_s23 = smul.u32 3, %s1223_s11 }
 0x23a   : > { %v740_v11 = vld [vmem:[#allocation2] sm:$0xf]  ;;  %vm770_vm6 = vcmask 293888   ;;  %v753_v16 = vsub.s32 0, %v1444_v32  ;;  %s845_s13 = sshll.u32 %s355_s14, 4  ;;  %s846_s13 = int_to_ptr.vmem [resolvable:$true] %s845_s13 }
 0x23b   : > { %v716_v39 = vrot.slane %v1136_v34, %v616_v36  ;;  %v683_v40 = vrot.slane %v1137_v35, %v616_v36  ;;  %v617_v42 = vrot.slane %v1138_v37, %v616_v36  ;;  %v650_v44 = vrot.slane %v1139_v43, %v616_v36  ;;  %v747_v12 = vld [vmem:[%s374_s29] sm:$0x1]  ;;  %s841_s7 = sadd.s32 %s1219_s10, %s1039_s23  ;;  %s1552_s10 = sand.u32 1, %s1211_s30  }
 0x23c   : > { %v748_v13 = vunpack.c.l.bf16 %v747_v12  ;;  %s977_s18 = sshll.u32 %s841_s7, 7  ;;  %s830_s17 = scalar_lea.sflag [#allocation6], %s1552_s10 }
 0x23d   : > { %717 = vrot.lane.b32.xlu0 %v716_v39, %s1252_s28  ;;  %684 = vrot.lane.b32.xlu1 %v683_v40, %s1253_s9  ;;  %s1472_s11 = scalar_lea.hbm %s1530_s8, %s977_s18  ;;  %s1143_s28 = scalar_lea.vmem %s846_s13, 128 }
 0x23e   : > { %p1144_p1 = scmp.ne.s32.totalorder %s846_s13, %s1143_s28  ;;  %s1259_s9 = smov [#allocation5]  }
 0x23f   : > { %v749_v14 = vstv %s746_s25 }
 0x240   : > { %v750_v15 = vmul.f32 %v749_v14, %v748_v13  ;;  %p1145_p2 = pnand %p1144_p1, %p1359_p3 }
 0x241   : > { %618 = vrot.lane.b32.xlu1 %v617_v42, %s1254_s12  ;;  %634 = vrot.lane.b32.xlu0 %v971_v28, %s1255_s16  ;;  %s1147_s12 = sshll.u32 %s1259_s9, 4  ;;  %s1148_s12 = int_to_ptr.vmem [resolvable:$false] %s1147_s12 }
 0x242   : > { %v754_v17 = vrot.slane %v750_v15, %v753_v16  ;;  %p1146_p4 = pneg %p1145_p2  ;;  %s1149_s16 = scalar_lea.vmem %s1148_s12, 256 }
 0x243   : > { %p1150_p5 = scmp.lt.s32.totalorder %s846_s13, %s1148_s12  ;;  %p1151_p6 = scmp.lt.s32.totalorder %s1149_s16, %s1143_s28 }
 0x245   : > { %651 = vrot.lane.b32.xlu1 %v650_v44, %s1256_s20  ;;  %821 = vperm.xlu0 %1135, %v818_v45   ;;  %p1152_p7 = por %p1151_p6, %p1150_p5 }
 0x247   : > { %p1153_p9 = pnand %p1152_p7, %p1146_p4 }
 0x2a6   : > { %v734_v47 = vpop.permute.xlu0 %733  ;;  %v701_v48 = vpop.permute.xlu1 %700 }
 0x2a7   : > { %v735_v49 = vrot.slane %v734_v47, 4  ;;  %v702_v50 = vrot.slane %v701_v48, 4 }
 0x2a9   : > { %v737_v51 = vsel %vm736_vm13, %v734_v47, %v735_v49  ;;  %v704_v52 = vsel %vm703_vm14, %v701_v48, %v702_v50 }
 0x2aa   : > { %739 = vst [vmem:[#allocation3 + $0x10] sm:$0x3] %v737_v51  ;;  %706 = vst [vmem:[#allocation3 + $0xc] sm:$0x3] %v704_v52  ;;  %v668_v53 = vpop.permute.xlu0 %667 }
 0x2ab   : > { %v669_v54 = vrot.slane %v668_v53, 4 }
 0x2ad   : > { %v671_v55 = vsel %vm670_vm15, %v668_v53, %v669_v54 }
 0x2ae   : > { %673 = vst [vmem:[#allocation3 + $0x8] sm:$0x3] %v671_v55 }
 0x2af   : > { %v718_v56 = vpop.permute.xlu0 %717  ;;  %v685_v57 = vpop.permute.xlu1 %684 }
 0x2b0   : > { %v719_v58 = vrot.slane %v718_v56, 4  ;;  %v686_v59 = vrot.slane %v685_v57, 4 }
 0x2b1   : > { %v1140_v60 = vld [vmem:[#allocation3 + $0x10] ss:$0 sps:$4 sm:$0x33]  }
 0x2b2   : > { %v721_v61 = vsel %vm720_vm0, %v718_v56, %v719_v58  ;;  %v688_v62 = vsel %vm687_vm1, %v685_v57, %v686_v59  ;;  %v776_v1 = vsel %vm774_vm2, %v1140_v60, 0 }
 0x2b3   : > { %723 = vst [vmem:[#allocation3 + $0xc] sm:$0xc] %v721_v61  ;;  %690 = vst [vmem:[#allocation3 + $0x8] sm:$0xc] %v688_v62  ;;  %v619_v63 = vpop.permute.xlu1 %618  ;;  %v635_v0 = vpop.permute.xlu0 %634  ;;  %1028 = vmatpush3.bf16.msra.mxu0 %v776_v1 }
 0x2b4   : > { %v620_v2 = vrot.slane %v619_v63, 4  ;;  %v636_v3 = vrot.slane %v635_v0, 4  ;;  %1029 = vmatprep.subr.bf16.mxu0 %v1251_v41 }
 0x2b6   : > { %v622_v4 = vsel %vm621_vm3, %v619_v63, %v620_v2  ;;  %v638_v5 = vsel %vm637_vm4, %v635_v0, %v636_v3 }
 0x2b7   : > { %624 = vst [vmem:[#allocation3] sm:$0xc] %v622_v4  ;;  %640 = vst [vmem:[#allocation3 + $0x4] sm:$0x3] %v638_v5  ;;  %v652_v6 = vpop.permute.xlu1 %651 }
 0x2b8   : > { %v653_v7 = vrot.slane %v652_v6, 4 }
 0x2ba   : > { %v655_v8 = vsel %vm654_vm5, %v652_v6, %v653_v7  ;;  %v1141_v9 = vld [vmem:[#allocation3 + $0x8] sm:$0xff]  }
 0x2bb   : > { %657 = vst [vmem:[#allocation3 + $0x4] sm:$0xc] %v655_v8  ;;  %1030 = vmatpush3.bf16.msra.mxu0 %v1141_v9 }
 0x2bc   : > { %1031 = vmatprep.subr.bf16.mxu0 %v1251_v41 }
 0x2c0   : > { %v822_v19 = vpop.permute.xlu0 %821 }
 0x2c2   : > { %v1142_v10 = vld [vmem:[#allocation3] sm:$0xff]  }
 0x2c3   : > { %1032 = vmatpush3.bf16.msra.mxu0 %v1142_v10 }
 0x2c6   : > { %1034 = vmatmul.mubr.msk.bf16.vlgmr.msra.gmra.mxu0 %vm770_vm6, %v740_v11 }
 0x386   : > { %v812_v18 = vpop.f32.mrf.mxu0 }
 0x387   : > { %v813_v20 = vadd.f32 %v812_v18, %v754_v17 }
 0x388   : > { %v1035_v21 = vpop.f32.mrf.mxu0 }
 0x389   : > { %v824_v22 = vadd.f32 %v822_v19, %v813_v20 }
 0x38a   : > { %v815_v23 = vpop.f32.mrf.mxu0 }
 0x38b   : > { %vm825_vm7 = vcmp.gt.f32.partialorder %v824_v22, 0.0  ;;  %v826_v24 = vmul.f32 0.2, %v824_v22 }
 0x38c   : > { %v1036_v25 = vpop.f32.mrf.mxu0 }
 0x38d   : > { %v827_v26 = vsel %vm825_vm7, %v824_v22, %v826_v24 }
 0x38e   : > { %828 = vst [vmem:[%s355_s14] sm:$0xff] %v827_v26 }
 0x38f   : > { %1156 = shalt.err (!%p1153_p9)
}
 0x390   : > { %s1157_s14 = scalar_lea.hbm %s1472_s11, 128  ;;  %s1161_s24 = scalar_lea.hbm %s1530_s8, 768 }
 0x391   : > { %p1158_p10 = scmp.ne.s32.totalorder %s1472_s11, %s1157_s14  ;;  %p1162_p13 = scmp.lt.s32.totalorder %s1472_s11, %s1530_s8 }
 0x392   : > { %p1163_p0 = scmp.lt.s32.totalorder %s1161_s24, %s1157_s14 }
 0x393   : > { %p1159_p11 = pnand %p1158_p10, %p1359_p3 }
 0x394   : > { %p1164_p1 = por %p1163_p0, %p1162_p13 }
 0x395   : > { %p1160_p12 = pneg %p1159_p11 }
 0x397   : > { %p1165_p2 = pnand %p1164_p1, %p1160_p12 }
 0x399   : > { %1168 = shalt.err (!%p1165_p2)
}
 0x39a   : > { %1040 = dma.vmem_to_hbm [thread:$0]  (%p1359_p3), %s846_s13, 128, %s1472_s11, %s830_s17  }
 0x39b PF: > { %s1553_s21 = sld [smem:[#allocation12_spill]] }
 0x39c   : > { %s1554_s22 = sld [smem:[#allocation8_spill]] }
 0x3a1   : > { %p1046_p4 = scmp.ge.s32.totalorder %s1553_s21, 2 }
 0x3a2   : > { %s857_s7 = sand.u32 1, %s1554_s22  }
 0x3a3   : > { %p1043_p5 = pnand %p1046_p4, %p1368_p8  ;;  %s858_s18 = scalar_lea.sflag [#allocation6], %s857_s7 }
 0x3a5   : > { %p1044_p6 = pneg %p1043_p5 }
 0x3a7   : > { %1202 = dma.done.wait (%p1044_p6), %s858_s18, 128  }
 0x3a8   : > { %1204 = vsyncadd (%p1044_p6), %s858_s18, 4294967168  ;;  %s22_s14 = sadd.s32 1, %s1553_s21   ;;  %s1556_s27 = sld [smem:[#allocation9_spill]] }
 0x3a9   : > { %p19_p7 = scmp.ge.s32.totalorder %s22_s14, 8   ;;  %s1557_s9 = sld [smem:[#allocation16_spill]] }
 0x3aa   : > { %s1558_s10 = sld [smem:[#allocation10_spill]]  ;;  %s1562_s29 = smov %s1211_s30 }
 0x3ab   : > { %s1559_s11 = sld [smem:[#allocation11_spill]]  ;;  %21 = sbr.rel (!%p19_p7) target bundleno = 7 (0x7), region = 97 }
 0x3ac   : > { %s1560_s12 = sld [smem:[#allocation13_spill]] }
 0x3ad   : > { %s1561_s13 = sld [smem:[#allocation14_spill]] }
 0x3ae   : > { %s1563_s30 = smov %s1556_s27 }
 0x3b0   :  { %863 = vsyncpa [#allocation6], 1 }
 0x3b1   :  { %865 = vsyncpa [#allocation6 + $0x1], 1 }

</bundles_post_ra>
